<compile_context>
chip_gen: v5e
topology: v5e:2x2
jax: 0.10.0
libtpu: 0.0.40
codegen_flags: <defaults>
</compile_context>

<pallas_src>
import functools

import jax
import jax.numpy as jnp
import numpy as np
from jax.experimental import pallas as pl
from jax.experimental.pallas import tpu as pltpu


def _mp_matvec_kernel(e_ref, a_ref, o_ref, *, t_src):
    # grid = (dst_tiles, src_tiles); src (axis 1, last) is the reduction axis,
    # so the output block is resident across it and accumulates in place (f32).
    k = pl.program_id(1)

    @pl.when(k == 0)
    def _():
        o_ref[...] = jnp.zeros_like(o_ref)

    # e is resident in VMEM as (num_src_tiles, t_src); pick the current chunk
    # with a leading-axis dynamic slice (no per-step re-DMA of e).
    e_blk = e_ref[pl.ds(k, 1), :]                      # (1, t_src)
    # y_tile[dst] += sum_src e[src] * A[src, dst]  -> MXU, f32 accumulation.
    o_ref[...] += jnp.dot(e_blk, a_ref[...],
                          preferred_element_type=jnp.float32)


def _cdiv(a, b):
    return -(-a // b)


def _round_up(n, m):
    return _cdiv(n, m) * m


def _pick_tiling(n, target_elems, min_tiles=1):
    """Pick a 128-multiple tile near `target_elems`, then pad `n` to a multiple of it.

    Returns (tile, padded_dim) with padded_dim % tile == 0 and tile % 128 == 0.
    Waste is at most ~one tile (and the tile is shrunk, not the pad grown, when
    the target is comparable to n).
    """
    n128 = _round_up(max(int(n), 1), 128)
    target = max(128, _round_up(int(target_elems), 128))
    k = _cdiv(n128, target)                    # number of tiles at the target size
    if n128 >= 128 * min_tiles:
        k = max(k, min_tiles)                  # keep >=2 dst tiles for megacore
    k = min(k, n128 // 128)                    # tile cannot go below 128
    tile = _round_up(_cdiv(n128, k), 128)
    padded = tile * _cdiv(n128, tile)
    return tile, padded


@functools.partial(jax.jit, static_argnames=("stream_dtype",))
def mp_layer(indices, e_scores, p_scores, relation_mask,
             stream_dtype=jnp.bfloat16):
    """JAX/Pallas equivalent of MPLayer.forward((indices, e_scores, p_scores, relation_mask))."""
    num_entities = e_scores.shape[0]
    itemsize = jnp.dtype(stream_dtype).itemsize

    # ---- Tiling: ~16 MiB of A per tile (double-buffered ~32 MiB < 48 MiB
    # limit, safe on v7x's 64 MiB VMEM and near-optimal on v5e/v6e), dst axis
    # split into >=2 tiles when possible so both v7x TensorCores are used. ----
    target_src = 2048
    target_dst = max(128, (16 * 1024 * 1024) // (target_src * itemsize))
    t_src, e_src_pad = _pick_tiling(num_entities, target_src, min_tiles=1)
    t_dst, e_dst_pad = _pick_tiling(num_entities, target_dst, min_tiles=2)
    num_src_tiles = e_src_pad // t_src

    # ---- JAX glue: gather predicate scores, fold the relation sum into the
    # scatter-add (column % E) so only a single (E, E) dense matrix is built,
    # directly in stream_dtype (single E^2*itemsize HBM write). ----
    # TODO(synk): the dynamic gather/scatter of arbitrary sparse edge indices has
    # no clean Pallas equivalent; it stays in XLA (switch to sort+segment_sum if
    # the scatter ever profiles as serialized for very large NNZ).
    vals = p_scores.reshape(-1)[relation_mask].astype(stream_dtype)
    rows = indices[0]
    dst = indices[1] % num_entities            # fold relation index out of the column

    a = jnp.zeros((e_src_pad, e_dst_pad), stream_dtype)
    a = a.at[rows, dst].add(vals)              # duplicate indices summed, like sparse.mm

    e_flat = jnp.zeros((e_src_pad,), stream_dtype)
    e_flat = e_flat.at[:num_entities].set(e_scores.reshape(-1).astype(stream_dtype))
    e_tiles = e_flat.reshape(num_src_tiles, t_src)   # resident in VMEM, sliced per k

    grid = (e_dst_pad // t_dst, e_src_pad // t_src)  # (parallel dst, reduction src)

    cost = pl.CostEstimate(
        flops=2 * e_src_pad * e_dst_pad,
        transcendentals=0,
        bytes_accessed=(e_src_pad * e_dst_pad * itemsize      # A stream (dominant)
                        + e_src_pad * itemsize                # e (once)
                        + e_dst_pad * 4),                     # output
    )

    out = pl.pallas_call(
        functools.partial(_mp_matvec_kernel, t_src=t_src),
        out_shape=jax.ShapeDtypeStruct((1, e_dst_pad), jnp.float32),
        grid=grid,
        in_specs=[
            # e: full row resident in VMEM (block index never changes -> one DMA).
            pl.BlockSpec((num_src_tiles, t_src), lambda j, k: (0, 0)),
            # A tile: streamed, double-buffered.
            pl.BlockSpec((t_src, t_dst), lambda j, k: (k, j)),
        ],
        out_specs=pl.BlockSpec((1, t_dst), lambda j, k: (0, j)),
        compiler_params=pltpu.CompilerParams(
            dimension_semantics=("parallel", "arbitrary"),   # dst shards across TCs (v7x)
            vmem_limit_bytes=48 * 1024 * 1024,
        ),
        cost_estimate=cost,
    )(e_tiles, a)

    return out[0, :num_entities]               # (num_entities,), matches PyTorch output


if __name__ == "__main__":
    key = jax.random.PRNGKey(0)
    E, R, NNZ = 16, 4, 48  # num_entities, num_relations, number of sparse edges

    k1, k2, k3, k4, k5 = jax.random.split(key, 5)
    e_scores = jax.random.normal(k1, (E, 1), dtype=jnp.float32)        # entity scores
    p_scores = jax.random.normal(k2, (R, E), dtype=jnp.float32)        # predicate scores
    rows = jax.random.randint(k3, (NNZ,), 0, E, dtype=jnp.int32)       # source entity per edge
    cols = jax.random.randint(k4, (NNZ,), 0, E * R, dtype=jnp.int32)   # (relation, dst) flat index
    indices = jnp.stack([rows, cols], axis=0)                          # (2, NNZ)
    relation_mask = jax.random.randint(k5, (NNZ,), 0, R * E, dtype=jnp.int32)

    # f32 streaming: tight check of the kernel / folded-scatter logic.
    y_f32 = mp_layer(indices, e_scores, p_scores, relation_mask,
                     stream_dtype=jnp.float32)
    # bf16 streaming: the production (memory-bound) configuration.
    y_bf16 = mp_layer(indices, e_scores, p_scores, relation_mask,
                      stream_dtype=jnp.bfloat16)
    jax.block_until_ready((y_f32, y_bf16))

    # Pure-numpy reference of the PyTorch forward.
    vals_np = np.asarray(p_scores).reshape(-1)[np.asarray(relation_mask)]
    A = np.zeros((E, E * R), np.float32)
    np.add.at(A, (np.asarray(rows), np.asarray(cols)), vals_np)
    y_ref = (A.T @ np.asarray(e_scores)).reshape(R, E).sum(axis=0)

    assert y_f32.shape == (E,)
    assert np.allclose(np.asarray(y_f32), y_ref, atol=1e-5, rtol=1e-5)
    # bf16 path rounds the streamed operands and the duplicate-edge accumulation;
    # loose tolerance accounts for that.
    assert np.allclose(np.asarray(y_bf16), y_ref, atol=2e-1, rtol=2e-1)

    print("KERNEL_OK")
</pallas_src>

<mosaic_0001>
module attributes {stable_mosaic.version = 11 : i64} {
  func.func @_mp_matvec_kernel(%arg0: i32, %arg1: i32, %arg2: memref<1x128xf32, #tpu.memory_space<vmem>>, %arg3: memref<128x128xf32, #tpu.memory_space<vmem>>, %arg4: memref<1x128xf32, #tpu.memory_space<vmem>>) attributes {dimension_semantics = [#tpu.dimension_semantics<parallel>, #tpu.dimension_semantics<arbitrary>], iteration_bounds = array<i64: 1, 1>, scalar_prefetch = 0 : i64, scratch_operands = 0 : i64, tpu.core_type = #tpu.core_type<tc>, window_params = [{pipeline_mode = #tpu.pipeline_mode<synchronous>, transform_indices = @transform_0, window_bounds = array<i64: 1, 128>}, {transform_indices = @transform_1, window_bounds = array<i64: 128, 128>}, {transform_indices = @transform_2, window_bounds = array<i64: 1, 128>}]} {
    %c0_i32 = arith.constant 0 : i32
    %0 = arith.cmpi eq, %arg1, %c0_i32 : i32
    %1 = arith.extui %0 : i1 to i32
    %c0_i32_0 = arith.constant 0 : i32
    %2 = arith.cmpi ne, %1, %c0_i32_0 : i32
    scf.if %2 {
      %cst_7 = arith.constant 0.000000e+00 : f32
      %10 = vector.broadcast %cst_7 : f32 to vector<1x128xf32>
      %c0_8 = arith.constant 0 : index
      %c0_9 = arith.constant 0 : index
      %11 = vector.load %arg4[%c0_8, %c0_9] : memref<1x128xf32, #tpu.memory_space<vmem>>, vector<1x128xf32>
      tpu.vector_store %arg4[%c0_8, %c0_9], %10 {strides = array<i32>} : memref<1x128xf32, #tpu.memory_space<vmem>>, vector<1x128xf32>,
    } else {
    }
    %3 = arith.index_cast %arg1 : i32 to index
    %c0 = arith.constant 0 : index
    %4 = vector.load %arg2[%3, %c0] : memref<1x128xf32, #tpu.memory_space<vmem>>, vector<1x128xf32>
    %c0_1 = arith.constant 0 : index
    %c0_2 = arith.constant 0 : index
    %5 = vector.load %arg4[%c0_1, %c0_2] : memref<1x128xf32, #tpu.memory_space<vmem>>, vector<1x128xf32>
    %c0_3 = arith.constant 0 : index
    %c0_4 = arith.constant 0 : index
    %6 = vector.load %arg3[%c0_3, %c0_4] : memref<128x128xf32, #tpu.memory_space<vmem>>, vector<128x128xf32>
    %cst = arith.constant dense<0.000000e+00> : vector<1x128xf32>
    %7 = tpu.matmul %4, %6, %cst {dimension_numbers = #tpu.dot_dimension_numbers<[1], [0], [0], [1], [0, 0, 1, 1], [], []>} : vector<1x128xf32>, vector<128x128xf32>, vector<1x128xf32> -> vector<1x128xf32>
    %8 = arith.addf %5, %7 : vector<1x128xf32>
    %c0_5 = arith.constant 0 : index
    %c0_6 = arith.constant 0 : index
    %9 = vector.load %arg4[%c0_5, %c0_6] : memref<1x128xf32, #tpu.memory_space<vmem>>, vector<1x128xf32>
    tpu.vector_store %arg4[%c0_5, %c0_6], %8 {strides = array<i32>} : memref<1x128xf32, #tpu.memory_space<vmem>>, vector<1x128xf32>,
    return
  }
  func.func @transform_0(%arg0: i32, %arg1: i32) -> (i32, i32) {
    %c0_i32 = arith.constant 0 : i32
    %c0_i32_0 = arith.constant 0 : i32
    %c0_i32_1 = arith.constant 0 : i32
    return %c0_i32, %c0_i32_0 : i32, i32
  }
  func.func @transform_1(%arg0: i32, %arg1: i32) -> (i32, i32) {
    %c0_i32 = arith.constant 0 : i32
    return %arg1, %arg0 : i32, i32
  }
  func.func @transform_2(%arg0: i32, %arg1: i32) -> (i32, i32) {
    %c0_i32 = arith.constant 0 : i32
    %c0_i32_0 = arith.constant 0 : i32
    return %c0_i32, %arg0 : i32, i32
  }
}

</mosaic_0001>

<bundles_post_ra>
// kernel: mp_layer.1
= control target key start
LH: loop header
LB: loop body
LE: loop exit
PB: predicated region body
PF: predicated region fallthrough
CT: control target
= control target key end

     0   :  { %v61_v2 = vmov 0.0   ;;  %s137_s1 = inlined_call_operand.vmem [shape: f32[128,128], index: 1, kind: input, shape index: {}]   ;;  %s138_s2 = inlined_call_operand.vmem [shape: f32[1,128], index: 2, kind: output, shape index: {}]   ;;  %s139_s0 = inlined_call_operand.vmem [shape: f32[1,128], index: 0, kind: input, shape index: {}]  }
   0x1   :  { %v33_v0 = vld [vmem:[%s137_s1 + $0x78] sm:$0xff]  ;;  %v32_v1 = vld [vmem:[%s137_s1 + $0x70] sm:$0xff]  ;;  %15 = vst [vmem:[%s138_s2] sm:$0x1] %v61_v2  ;;  %v31_v3 = vld [vmem:[%s137_s1 + $0x68] sm:$0xff] }
   0x2   :  { %34 = vmatpush.msra.mxu0 %v33_v0  ;;  %v30_v4 = vld [vmem:[%s137_s1 + $0x60] sm:$0xff]  ;;  %v29_v5 = vld [vmem:[%s137_s1 + $0x58] sm:$0xff]  ;;  %v28_v6 = vld [vmem:[%s137_s1 + $0x50] sm:$0xff] }
   0x3   :  { %v27_v7 = vld [vmem:[%s137_s1 + $0x48] sm:$0xff]  ;;  %v26_v8 = vld [vmem:[%s137_s1 + $0x40] sm:$0xff]  ;;  %v25_v9 = vld [vmem:[%s137_s1 + $0x38] sm:$0xff] }
   0x4   :  { %35 = vmatpush.msra.mxu0 %v32_v1  ;;  %v24_v10 = vld [vmem:[%s137_s1 + $0x30] sm:$0xff]  ;;  %v23_v11 = vld [vmem:[%s137_s1 + $0x28] sm:$0xff]  ;;  %v22_v12 = vld [vmem:[%s137_s1 + $0x20] sm:$0xff] }
   0x5   :  { %v21_v13 = vld [vmem:[%s137_s1 + $0x18] sm:$0xff]  ;;  %v20_v14 = vld [vmem:[%s137_s1 + $0x10] sm:$0xff]  ;;  %v19_v15 = vld [vmem:[%s137_s1 + $0x8] sm:$0xff] }
   0x6   :  { %36 = vmatpush.msra.mxu0 %v31_v3  ;;  %v18_v16 = vld [vmem:[%s137_s1] sm:$0xff] }
   0x7   :  { %v16_v17 = vld [vmem:[%s139_s0] sm:$0x1] }
   0x8   :  { %37 = vmatpush.msra.mxu0 %v30_v4  ;;  %v17_v18 = vld [vmem:[%s138_s2] sm:$0x1] }
   0xa   :  { %38 = vmatpush.msra.mxu0 %v29_v5 }
   0xc   :  { %39 = vmatpush.msra.mxu0 %v28_v6 }
   0xe   :  { %40 = vmatpush.msra.mxu0 %v27_v7 }
  0x10   :  { %41 = vmatpush.msra.mxu0 %v26_v8 }
  0x12   :  { %42 = vmatpush.msra.mxu0 %v25_v9 }
  0x14   :  { %43 = vmatpush.msra.mxu0 %v24_v10 }
  0x16   :  { %44 = vmatpush.msra.mxu0 %v23_v11 }
  0x18   :  { %45 = vmatpush.msra.mxu0 %v22_v12 }
  0x1a   :  { %46 = vmatpush.msra.mxu0 %v21_v13 }
  0x1c   :  { %47 = vmatpush.msra.mxu0 %v20_v14 }
  0x1e   :  { %48 = vmatpush.msra.mxu0 %v19_v15 }
  0x20   :  { %49 = vmatpush.msra.mxu0 %v18_v16 }
  0x21   :  { %50 = vmatmul.f32.vlgmr.msra.gmra.mxu0 %v16_v17 }
  0x9e   :  { %v51_v19 = vpop.f32.mrf.mxu0 }
  0x9f   :  { %v54_v20 = vadd.f32 %v51_v19, %v17_v18 }
  0xa1   :  { %55 = vst [vmem:[%s138_s2] sm:$0x1] %v54_v20 }

</bundles_post_ra>
